<compile_context>
chip_gen: v7x
topology: tpu7x:2x2x1
jax: 0.10.0
libtpu: 0.0.40
codegen_flags: <defaults>
</compile_context>

<pallas_src>
import functools
import math

import jax
import jax.numpy as jnp
from jax.experimental import pallas as pl
from jax.experimental.pallas import tpu as pltpu


_TM_TARGET = 512                      # row tile (mem-bound roofline sweet spot)
_RESIDENT_BUDGET = 24 * 1024 * 1024   # VMEM estimate below which weight stays resident
_VMEM_LIMIT = 40 * 1024 * 1024        # explicit scoped-VMEM limit (safe on v5e/v6e/v7x)
_MASK_VALUE = -1e6                    # d2l masked_softmax mask value
_LN_EPS = 1e-5                        # torch.nn.LayerNorm default eps


def _round_up(x, m):
    return ((x + m - 1) // m) * m


def _pick_tile(dim, target, granule):
    """Largest multiple of `granule` <= target that divides `dim`."""
    if dim <= target:
        return dim
    t = (target // granule) * granule
    while t > granule:
        if dim % t == 0:
            return t
        t -= granule
    return granule


def _resident_fits(tm, K, N, has_residual):
    need = (2 * K * N * 2            # weight (assume double-buffered), bf16
            + 2 * tm * K * 2         # double-buffered x blocks
            + 2 * tm * N * 2         # double-buffered out blocks
            + (2 * tm * N * 2 if has_residual else 0)
            + 6 * N * 4)             # bias / gamma / beta
    return need <= _RESIDENT_BUDGET


# ---------------------------------------------------------------------------
# Kernel 1: linear with VMEM-resident weight + fused epilogue
#   o = epilogue(x @ w + b)  where epilogue = [relu|tanh] -> [+residual] -> [LN]
# ---------------------------------------------------------------------------

def _make_resident_kernel(activation, has_residual, has_ln, eps):
    def kernel(*refs):
        x_ref, w_ref, b_ref = refs[0], refs[1], refs[2]
        i = 3
        res_ref = None
        g_ref = bt_ref = None
        if has_residual:
            res_ref = refs[i]; i += 1
        if has_ln:
            g_ref, bt_ref = refs[i], refs[i + 1]; i += 2
        o_ref = refs[i]

        y = jnp.dot(x_ref[...], w_ref[...],
                    preferred_element_type=jnp.float32) + b_ref[...]
        if activation == "relu":
            y = jnp.maximum(y, 0.0)
        elif activation == "tanh":
            y = jnp.tanh(y)
        if has_residual:
            # TODO(synk): dropout before the residual add treated as identity.
            y = y + res_ref[...].astype(jnp.float32)
        if has_ln:
            mean = jnp.mean(y, axis=-1, keepdims=True)
            c = y - mean
            var = jnp.mean(c * c, axis=-1, keepdims=True)
            y = c * jax.lax.rsqrt(var + eps) * g_ref[...] + bt_ref[...]
        o_ref[...] = y.astype(o_ref.dtype)
    return kernel


def _make_tiled_kernel(activation):
    def kernel(x_ref, w_ref, b_ref, o_ref):
        y = jnp.dot(x_ref[...], w_ref[...],
                    preferred_element_type=jnp.float32) + b_ref[...]
        if activation == "relu":
            y = jnp.maximum(y, 0.0)
        elif activation == "tanh":
            y = jnp.tanh(y)
        o_ref[...] = y.astype(o_ref.dtype)
    return kernel


def linear(x2d, w, b, activation=None, residual=None, ln=None,
           out_dtype=jnp.bfloat16):
    """x2d: (M, K). w: (K, N) pre-transposed bf16 weight. b: (N,) f32.
    Optional fused epilogue: activation -> +residual -> LayerNorm(gamma, beta)."""
    M, K = x2d.shape
    K2, N = w.shape
    assert K == K2
    x2d = x2d.astype(jnp.bfloat16)
    if residual is not None:
        residual = residual.astype(jnp.bfloat16)

    tm = _round_up(M, 8) if M <= _TM_TARGET else _TM_TARGET
    Mp = _round_up(M, tm)
    if Mp != M:
        x2d = jnp.pad(x2d, ((0, Mp - M), (0, 0)))
        if residual is not None:
            residual = jnp.pad(residual, ((0, Mp - M), (0, 0)))

    b2 = b.reshape(1, N).astype(jnp.float32)
    has_res = residual is not None
    has_ln = ln is not None
    resident = _resident_fits(tm, K, N, has_res)
    if has_ln:
        assert resident, "fused LayerNorm needs the full feature row resident"

    trans = Mp * N if activation == "tanh" else 0

    if resident:
        in_specs = [
            pl.BlockSpec((tm, K), lambda i: (i, 0)),
            pl.BlockSpec((K, N), lambda i: (0, 0)),     # constant index -> resident
            pl.BlockSpec((1, N), lambda i: (0, 0)),
        ]
        args = [x2d, w, b2]
        if has_res:
            in_specs.append(pl.BlockSpec((tm, N), lambda i: (i, 0)))
            args.append(residual)
        if has_ln:
            gamma, beta = ln
            in_specs += [pl.BlockSpec((1, N), lambda i: (0, 0)),
                         pl.BlockSpec((1, N), lambda i: (0, 0))]
            args += [gamma.reshape(1, N).astype(jnp.float32),
                     beta.reshape(1, N).astype(jnp.float32)]

        out = pl.pallas_call(
            _make_resident_kernel(activation, has_res, has_ln, _LN_EPS),
            out_shape=jax.ShapeDtypeStruct((Mp, N), out_dtype),
            grid_spec=pltpu.PrefetchScalarGridSpec(
                num_scalar_prefetch=0, grid=(Mp // tm,),
                in_specs=in_specs,
                out_specs=pl.BlockSpec((tm, N), lambda i: (i, 0))),
            compiler_params=pltpu.CompilerParams(
                dimension_semantics=("parallel",),
                vmem_limit_bytes=_VMEM_LIMIT),
            cost_estimate=pl.CostEstimate(
                flops=int(2 * Mp * N * K),
                transcendentals=int(trans),
                bytes_accessed=int(2 * (Mp * K + K * N + Mp * N))),
        )(*args)
    else:
        # Big-N path (vocab-size MLM head): stream (K, tn) weight tiles.
        Np = _round_up(N, 128)
        wp, bp = w, b2
        if Np != N:  # heads are pre-padded at init; defensive fallback only
            wp = jnp.pad(w, ((0, 0), (0, Np - N)))
            bp = jnp.pad(b2, ((0, 0), (0, Np - N)))
        tn = _pick_tile(Np, 512, 128)
        out = pl.pallas_call(
            _make_tiled_kernel(activation),
            out_shape=jax.ShapeDtypeStruct((Mp, Np), out_dtype),
            grid_spec=pltpu.PrefetchScalarGridSpec(
                num_scalar_prefetch=0, grid=(Mp // tm, Np // tn),
                in_specs=[
                    pl.BlockSpec((tm, K), lambda i, j: (i, 0)),
                    pl.BlockSpec((K, tn), lambda i, j: (0, j)),
                    pl.BlockSpec((1, tn), lambda i, j: (0, j)),
                ],
                out_specs=pl.BlockSpec((tm, tn), lambda i, j: (i, j))),
            compiler_params=pltpu.CompilerParams(
                dimension_semantics=("parallel", "parallel"),
                vmem_limit_bytes=_VMEM_LIMIT),
            cost_estimate=pl.CostEstimate(
                flops=int(2 * Mp * Np * K),
                transcendentals=int(trans),
                bytes_accessed=int(2 * (Mp * K + K * Np + Mp * Np))),
        )(x2d, wp, bp)
        if Np != N:
            out = out[:, :N]

    return out[:M] if Mp != M else out


# ---------------------------------------------------------------------------
# Kernel 2: masked dot-product attention, one (batch, head) tile per grid step
# ---------------------------------------------------------------------------

def _attn_kernel(vl_ref, q_ref, k_ref, v_ref, o_ref, *, scale):
    b = pl.program_id(0)
    q = (q_ref[...][0, 0].astype(jnp.float32) * scale).astype(jnp.bfloat16)
    k = k_ref[...][0, 0]
    v = v_ref[...][0, 0]

    # scores[i, j] = <q[i, :], k[j, :]>  -- contraction on d, no in-kernel k.T
    s = jax.lax.dot_general(q, k, (((1,), (1,)), ((), ())),
                            preferred_element_type=jnp.float32)      # (Sq, Sk)

    # d2l masked_softmax: key positions >= valid_len -> -1e6 before softmax.
    # TODO(synk): only 1-D (per-batch) valid_lens supported, like the reference call.
    vl = vl_ref[b]
    col = jax.lax.broadcasted_iota(jnp.int32, (1, s.shape[-1]), 1)   # (1, Sk)
    s = jnp.where(col < vl, s, jnp.float32(_MASK_VALUE))

    m = jnp.max(s, axis=-1, keepdims=True)
    e = jnp.exp(s - m)
    denom = jnp.sum(e, axis=-1, keepdims=True)
    p = e * pl.reciprocal(denom, approx=True)   # EUP reciprocal, off the VALU path
    # TODO(synk): attention-weight dropout treated as identity (eval mode).

    out = jnp.dot(p.astype(v.dtype), v, preferred_element_type=jnp.float32)
    o_ref[...] = out[None, None].astype(o_ref.dtype)
    # TODO(synk): for very long sequences switch to a flash-style online-softmax
    # loop over Sk tiles instead of a single (Sq, Sk) score block.


def dot_product_attention(q, k, v, valid_lens):
    """q: (B, H, Sq, d); k, v: (B, H, Sk, d); valid_lens: (B,) int or None."""
    B, H, Sq, d = q.shape
    Sk = k.shape[2]
    vl = (jnp.full((B,), Sk, dtype=jnp.int32) if valid_lens is None
          else valid_lens.astype(jnp.int32))

    def spec(S):
        return pl.BlockSpec((1, 1, S, d), lambda b, h, vl_ref: (b, h, 0, 0))

    return pl.pallas_call(
        functools.partial(_attn_kernel, scale=1.0 / math.sqrt(d)),
        out_shape=jax.ShapeDtypeStruct((B, H, Sq, d), q.dtype),
        grid_spec=pltpu.PrefetchScalarGridSpec(
            num_scalar_prefetch=1,
            grid=(B, H),
            in_specs=[spec(Sq), spec(Sk), spec(Sk)],
            out_specs=spec(Sq)),
        compiler_params=pltpu.CompilerParams(
            dimension_semantics=("parallel", "parallel"),
            vmem_limit_bytes=_VMEM_LIMIT),
        cost_estimate=pl.CostEstimate(
            flops=int(4 * B * H * Sq * Sk * d),
            transcendentals=int(B * H * Sq * Sk),
            bytes_accessed=int(2 * B * H * (2 * Sq * d + 2 * Sk * d))),
    )(vl, q, k, v)


# ---------------------------------------------------------------------------
# Model forward (wrappers)
# ---------------------------------------------------------------------------

def attention_context(p, X2, valid_lens, num_heads, B, S):
    """Per the reference: W_q is applied to queries, keys AND values (self-attn
    -> one projection); W_k/W_v exist in the params but are unused."""
    NH = p["W_q"].shape[1]
    d = NH // num_heads
    proj = linear(X2, p["W_q"], p["b_q"])                 # (B*S, NH) bf16
    # TODO(synk): head split/merge transposes stay in XLA — a direct (S, d)
    # block out of the packed layout would put a <128-lane dim last.
    qkv = proj.reshape(B, S, num_heads, d).transpose(0, 2, 1, 3)   # (B, H, S, d)
    ctx = dot_product_attention(qkv, qkv, qkv, valid_lens)         # (B, H, S, d)
    return ctx.transpose(0, 2, 1, 3).reshape(B * S, NH)


def encoder_block(p, X2, valid_lens, num_heads, B, S):
    """X2: (B*S, NH) bf16. AddNorm is fused into the W_o and FFN-W2 epilogues."""
    ctx = attention_context(p["attn"], X2, valid_lens, num_heads, B, S)
    Y2 = linear(ctx, p["attn"]["W_o"], p["attn"]["b_o"],
                residual=X2, ln=(p["gamma1"], p["beta1"]))
    H2 = linear(Y2, p["ffn"]["W1"], p["ffn"]["b1"], activation="relu")
    Z2 = linear(H2, p["ffn"]["W2"], p["ffn"]["b2"],
                residual=Y2, ln=(p["gamma2"], p["beta2"]))
    return Z2


def bert_encoder(p, tokens, segments, valid_lens, num_heads):
    # TODO(synk): embedding gathers stay in XLA (data-dependent gather has no
    # clean BlockSpec equivalent; would need a manual-DMA gather kernel).
    B, S = tokens.shape
    x = p["tok_emb"][tokens] + p["seg_emb"][segments] + p["pos_emb"][:, :S, :]
    x2 = x.reshape(B * S, -1).astype(jnp.bfloat16)
    for blk in p["blocks"]:
        x2 = encoder_block(blk, x2, valid_lens, num_heads, B, S)
    return x2.reshape(B, S, -1)


def mask_lm(p, X, pred_positions):
    B, num_pred = pred_positions.shape
    batch_idx = jnp.repeat(jnp.arange(B), num_pred)
    masked_x = X[batch_idx, pred_positions.reshape(-1)]   # XLA gather, (B*np, NH)
    # Linear -> ReLU -> LayerNorm fused into a single kernel epilogue.
    h = linear(masked_x, p["W1"], p["b1"], activation="relu",
               ln=(p["gamma"], p["beta"]))
    out = linear(h, p["W2"], p["b2"])[:, :p["vocab_size"]]
    return out.reshape(B, num_pred, -1)


def bert_model(params, tokens, segments, valid_lens=None, pred_positions=None,
               *, num_heads):
    encoded = bert_encoder(params["encoder"], tokens, segments, valid_lens, num_heads)
    mlm_y = (mask_lm(params["mlm"], encoded, pred_positions)
             if pred_positions is not None else None)
    cls = encoded[:, 0, :]
    h = linear(cls, params["hiddens"]["W"], params["hiddens"]["b"], activation="tanh")
    nsp_y = linear(h, params["nsp"]["W"], params["nsp"]["b"])[:, :2]
    return encoded, mlm_y, nsp_y


# ---------------------------------------------------------------------------
# Parameter setup: weights PRE-TRANSPOSED (in, out), stored bf16; small output
# heads padded ONCE to a multiple of 128 lanes (never padded per call).
# ---------------------------------------------------------------------------

def _linear_params(key, in_dim, out_dim, scale=0.1, pad_out_to=None):
    wkey, bkey = jax.random.split(key)
    w = scale * jax.random.normal(wkey, (in_dim, out_dim), jnp.float32)
    b = scale * jax.random.normal(bkey, (out_dim,), jnp.float32)
    if pad_out_to is not None and pad_out_to > out_dim:
        w = jnp.pad(w, ((0, 0), (0, pad_out_to - out_dim)))
        b = jnp.pad(b, (0, pad_out_to - out_dim))
    return w.astype(jnp.bfloat16), b.astype(jnp.float32)


def _block_params(key, num_hiddens, ffn_num_hiddens):
    ks = jax.random.split(key, 6)
    W_q, b_q = _linear_params(ks[0], num_hiddens, num_hiddens)
    W_k, b_k = _linear_params(ks[1], num_hiddens, num_hiddens)  # unused (faithful)
    W_v, b_v = _linear_params(ks[2], num_hiddens, num_hiddens)  # unused (faithful)
    W_o, b_o = _linear_params(ks[3], num_hiddens, num_hiddens)
    W_f1, b_f1 = _linear_params(ks[4], num_hiddens, ffn_num_hiddens)
    W_f2, b_f2 = _linear_params(ks[5], ffn_num_hiddens, num_hiddens)
    return {
        "attn": {"W_q": W_q, "b_q": b_q, "W_k": W_k, "b_k": b_k,
                 "W_v": W_v, "b_v": b_v, "W_o": W_o, "b_o": b_o},
        "gamma1": jnp.ones((num_hiddens,), jnp.float32),
        "beta1": jnp.zeros((num_hiddens,), jnp.float32),
        "ffn": {"W1": W_f1, "b1": b_f1, "W2": W_f2, "b2": b_f2},
        "gamma2": jnp.ones((num_hiddens,), jnp.float32),
        "beta2": jnp.zeros((num_hiddens,), jnp.float32),
    }


def init_params(key, vocab_size, num_hiddens, ffn_num_hiddens, num_layers, max_len):
    ks = jax.random.split(key, num_layers + 7)
    blocks = [_block_params(ks[i], num_hiddens, ffn_num_hiddens)
              for i in range(num_layers)]
    tok_emb = 0.1 * jax.random.normal(ks[num_layers], (vocab_size, num_hiddens), jnp.float32)
    seg_emb = 0.1 * jax.random.normal(ks[num_layers + 1], (2, num_hiddens), jnp.float32)
    pos_emb = jax.random.uniform(ks[num_layers + 2], (1, max_len, num_hiddens), jnp.float32)
    W_hid, b_hid = _linear_params(ks[num_layers + 3], num_hiddens, num_hiddens)
    W_m1, b_m1 = _linear_params(ks[num_layers + 4], num_hiddens, num_hiddens)
    W_m2, b_m2 = _linear_params(ks[num_layers + 5], num_hiddens, vocab_size,
                                pad_out_to=_round_up(vocab_size, 128))
    W_nsp, b_nsp = _linear_params(ks[num_layers + 6], num_hiddens, 2, pad_out_to=128)
    return {
        "encoder": {"tok_emb": tok_emb, "seg_emb": seg_emb,
                    "pos_emb": pos_emb, "blocks": blocks},
        "hiddens": {"W": W_hid, "b": b_hid},
        "mlm": {"W1": W_m1, "b1": b_m1,
                "gamma": jnp.ones((num_hiddens,), jnp.float32),
                "beta": jnp.zeros((num_hiddens,), jnp.float32),
                "W2": W_m2, "b2": b_m2, "vocab_size": vocab_size},
        "nsp": {"W": W_nsp, "b": b_nsp},
    }


# ---------------------------------------------------------------------------
# Demo
# ---------------------------------------------------------------------------

if __name__ == "__main__":
    B, S = 2, 8
    vocab_size = 128
    num_hiddens = 32
    num_heads = 4
    ffn_num_hiddens = 64
    num_layers = 2
    max_len = 64
    num_pred = 3

    key = jax.random.PRNGKey(0)
    pkey, tkey = jax.random.split(key)
    params = init_params(pkey, vocab_size, num_hiddens, ffn_num_hiddens,
                         num_layers, max_len)

    tokens = jax.random.randint(tkey, (B, S), 0, vocab_size, dtype=jnp.int32)
    segments = jnp.concatenate(
        [jnp.zeros((B, S // 2), jnp.int32), jnp.ones((B, S // 2), jnp.int32)], axis=1)
    valid_lens = jnp.array([5, 8], dtype=jnp.int32)
    pred_positions = jnp.array([[1, 5, 2], [6, 1, 5]], dtype=jnp.int32)

    encoded, mlm_y, nsp_y = bert_model(
        params, tokens, segments, valid_lens, pred_positions, num_heads=num_heads)
    jax.block_until_ready((encoded, mlm_y, nsp_y))

    assert encoded.shape == (B, S, num_hiddens)
    assert mlm_y.shape == (B, num_pred, vocab_size)
    assert nsp_y.shape == (B, 2)
    assert bool(jnp.all(jnp.isfinite(encoded.astype(jnp.float32))))
    assert bool(jnp.all(jnp.isfinite(mlm_y.astype(jnp.float32))))
    assert bool(jnp.all(jnp.isfinite(nsp_y.astype(jnp.float32))))
    print("KERNEL_OK")
</pallas_src>

<mosaic_0001>
module attributes {stable_mosaic.version = 11 : i64} {
  func.func @kernel(%arg0: i32, %arg1: memref<16x32xbf16, #tpu.memory_space<vmem>>, %arg2: memref<32x32xbf16, #tpu.memory_space<vmem>>, %arg3: memref<1x32xf32, #tpu.memory_space<vmem>>, %arg4: memref<16x32xbf16, #tpu.memory_space<vmem>>) attributes {dimension_semantics = [#tpu.dimension_semantics<parallel>], iteration_bounds = array<i64: 1>, scalar_prefetch = 0 : i64, scratch_operands = 0 : i64, tpu.core_type = #tpu.core_type<tc>, window_params = [{transform_indices = @transform_0, window_bounds = array<i64: 16, 32>}, {pipeline_mode = #tpu.pipeline_mode<synchronous>, transform_indices = @transform_1, window_bounds = array<i64: 32, 32>}, {pipeline_mode = #tpu.pipeline_mode<synchronous>, transform_indices = @transform_2, window_bounds = array<i64: 1, 32>}, {transform_indices = @transform_3, window_bounds = array<i64: 16, 32>}]} {
    %c0 = arith.constant 0 : index
    %c0_0 = arith.constant 0 : index
    %0 = vector.load %arg1[%c0, %c0_0] : memref<16x32xbf16, #tpu.memory_space<vmem>>, vector<16x32xbf16>
    %c0_1 = arith.constant 0 : index
    %c0_2 = arith.constant 0 : index
    %1 = vector.load %arg2[%c0_1, %c0_2] : memref<32x32xbf16, #tpu.memory_space<vmem>>, vector<32x32xbf16>
    %cst = arith.constant dense<0.000000e+00> : vector<16x32xf32>
    %2 = tpu.matmul %0, %1, %cst {dimension_numbers = #tpu.dot_dimension_numbers<[1], [0], [0], [1], [0, 0, 1, 1], [], []>} : vector<16x32xbf16>, vector<32x32xbf16>, vector<16x32xf32> -> vector<16x32xf32>
    %c0_3 = arith.constant 0 : index
    %c0_4 = arith.constant 0 : index
    %3 = vector.load %arg3[%c0_3, %c0_4] : memref<1x32xf32, #tpu.memory_space<vmem>>, vector<1x32xf32>
    %4 = vector.broadcast %3 : vector<1x32xf32> to vector<16x32xf32>
    %5 = arith.addf %2, %4 : vector<16x32xf32>
    %6 = arith.truncf %5 : vector<16x32xf32> to vector<16x32xbf16>
    %c0_5 = arith.constant 0 : index
    %c0_6 = arith.constant 0 : index
    %7 = vector.load %arg4[%c0_5, %c0_6] : memref<16x32xbf16, #tpu.memory_space<vmem>>, vector<16x32xbf16>
    tpu.vector_store %arg4[%c0_5, %c0_6], %6 {strides = array<i32>} : memref<16x32xbf16, #tpu.memory_space<vmem>>, vector<16x32xbf16>,
    return
  }
  func.func @transform_0(%arg0: i32) -> (i32, i32) {
    %c0_i32 = arith.constant 0 : i32
    %c0_i32_0 = arith.constant 0 : i32
    return %arg0, %c0_i32 : i32, i32
  }
  func.func @transform_1(%arg0: i32) -> (i32, i32) {
    %c0_i32 = arith.constant 0 : i32
    %c0_i32_0 = arith.constant 0 : i32
    %c0_i32_1 = arith.constant 0 : i32
    return %c0_i32, %c0_i32_0 : i32, i32
  }
  func.func @transform_2(%arg0: i32) -> (i32, i32) {
    %c0_i32 = arith.constant 0 : i32
    %c0_i32_0 = arith.constant 0 : i32
    %c0_i32_1 = arith.constant 0 : i32
    return %c0_i32, %c0_i32_0 : i32, i32
  }
  func.func @transform_3(%arg0: i32) -> (i32, i32) {
    %c0_i32 = arith.constant 0 : i32
    %c0_i32_0 = arith.constant 0 : i32
    return %arg0, %c0_i32 : i32, i32
  }
}

</mosaic_0001>

<bundles_post_ra>
// kernel: tpu_custom_call.1
= control target key start
LH: loop header
LB: loop body
LE: loop exit
PB: predicated region body
PF: predicated region fallthrough
CT: control target
= control target key end

     0   :  { %8 = vsyncpa [#allocation3], 0  ;;  %s325_s0 = inlined_call_operand.hbm [shape: bf16[16,32], index: 0, kind: input, shape index: {}]   ;;  %s326_s1 = inlined_call_operand.hbm [shape: bf16[32,32], index: 1, kind: input, shape index: {}]   ;;  %s327_s2 = inlined_call_operand.vmem [shape: f32[1,32], index: 2, kind: input, shape index: {}]   ;;  %s328_s3 = inlined_call_operand.hbm [shape: bf16[16,32], index: 3, kind: output, shape index: {}]  }
   0x1   :  { %9 = vsyncpa [#allocation6], 0 }
   0x2   :  { %10 = vsyncpa [#allocation4], 0  ;;  %s250_s12 = smov [#allocation2]   ;;  %s178_s16 = scalar_lea.hbm %s325_s0, 128 }
   0x3   :  { %s16_s13 = sshll.u32 %s250_s12, 4  ;;  %p179_p0 = scmp.ne.s32.totalorder %s325_s0, %s178_s16  ;;  %s17_s13 = int_to_ptr.vmem [resolvable:$true] %s16_s13 }
   0x4   :  { %p182_p1 = scmp.lt.u32.totalorder %s178_s16, %s325_s0 }
   0x6   :  { %p184_p2 = pnand %p182_p1, %p179_p0 }
   0x8   :  { %187 = shalt.err (!%p184_p2)
}
   0x9   :  { %s188_s21 = scalar_lea.vmem %s17_s13, 128  ;;  %p193_p4 = scmp.lt.s32.totalorder %s17_s13, %s17_s13 }
   0xa   :  { %p189_p3 = scmp.ne.s32.totalorder %s17_s13, %s188_s21  ;;  %p194_p5 = scmp.lt.s32.totalorder %s188_s21, %s188_s21 }
   0xc   :  { %p195_p6 = por %p194_p5, %p193_p4 }
   0xe   :  { %p196_p7 = pnand %p195_p6, %p189_p3 }
  0x10   :  { %199 = shalt.err (!%p196_p7)
}
  0x11   :  { %s251_s22 = smov 64   ;;  %s252_s23 = smov 4  }
  0x12   :  { %22 = dma.hbm_to_vmem [thread:$0]  %s325_s0, 128, %s17_s13, [#allocation3], %s251_s22, %s251_s22, %s252_s23  }
  0x13   :  { %s253_s26 = smov [#allocation5]   ;;  %s200_s30 = scalar_lea.hbm %s326_s1, 256 }
  0x14   :  { %s28_s27 = sshll.u32 %s253_s26, 4  ;;  %p201_p8 = scmp.ne.s32.totalorder %s326_s1, %s200_s30  ;;  %s29_s27 = int_to_ptr.vmem [resolvable:$true] %s28_s27 }
  0x15   :  { %p204_p9 = scmp.lt.u32.totalorder %s200_s30, %s326_s1 }
  0x17   :  { %p206_p10 = pnand %p204_p9, %p201_p8 }
  0x19   :  { %209 = shalt.err (!%p206_p10)
}
  0x1a   :  { %s210_s8 = scalar_lea.vmem %s29_s27, 256  ;;  %p215_p12 = scmp.lt.s32.totalorder %s29_s27, %s29_s27 }
  0x1b   :  { %p211_p11 = scmp.ne.s32.totalorder %s29_s27, %s210_s8  ;;  %p216_p13 = scmp.lt.s32.totalorder %s210_s8, %s210_s8 }
  0x1d   :  { %p217_p0 = por %p216_p13, %p215_p12 }
  0x1f   :  { %p218_p1 = pnand %p217_p0, %p211_p11 }
  0x21   :  { %221 = shalt.err (!%p218_p1)
}
  0x22   :  { %34 = dma.hbm_to_vmem [thread:$0]  %s326_s1, 256, %s29_s27, [#allocation6], %s251_s22, %s251_s22, %s252_s23  }
  0x23   :  { %244 = dma.done.wait [#allocation3], 128  }
  0x24   :  { %245 = vsyncadd [#allocation3], 4294967168 }
  0x25   :  { %246 = dma.done.wait [#allocation6], 256  }
  0x26   :  { %247 = vsyncadd [#allocation6], 4294967040  ;;  %v254_v0 = vmov 0.0   ;;  %vm255_vm0 = vmmov 0   ;;  %v175_v1 = vld [vmem:[#allocation5] sm:$0xff]   ;;  %v176_v2 = vld [vmem:[#allocation5 + $0x8] sm:$0xff]  }
  0x27   :  { %160 = vmatprep.subr.bf16.mxu0 %v254_v0  ;;  %164 = vmatprep.mubr.msk.bf16.mxu0 %vm255_vm0, %v254_v0  ;;  %v177_v3 = vld [vmem:[#allocation2] sm:$0xff]   ;;  %vm74_vm1 = vcmask 261120   ;;  %vm127_vm2 = vcmask 257024   ;;  %s256_s1 = smov [#allocation7]  }
  0x28   :  { %161 = vmatpush3.bf16.msra.mxu0 %v175_v1  ;;  %v148_v4 = vld [vmem:[%s327_s2] ss:$0 sm:$0xff]  ;;  %s135_s12 = sshll.u32 %s256_s1, 4  ;;  %s136_s12 = int_to_ptr.vmem [resolvable:$true] %s135_s12 }
  0x29   :  { %162 = vmatprep.subr.bf16.mxu0 %v254_v0  ;;  %s222_s13 = scalar_lea.vmem %s136_s12, 128  ;;  %p227_p3 = scmp.lt.s32.totalorder %s136_s12, %s136_s12 }
  0x2a   :  { %p223_p2 = scmp.ne.s32.totalorder %s136_s12, %s222_s13  ;;  %p228_p4 = scmp.lt.s32.totalorder %s222_s13, %s222_s13 }
  0x2c   :  { %163 = vmatpush3.bf16.msra.mxu0 %v176_v2  ;;  %p229_p5 = por %p228_p4, %p227_p3 }
  0x2e   :  { %p230_p6 = pnand %p229_p5, %p223_p2 }
  0x2f   :  { %165 = vmatmul.mubr.msk.bf16.vlgmr.msra.gmra.mrb[0].mxu0 %vm74_vm1, %v177_v3 }
 0x102   :  { %v112_v5 = vpop.f32.mrb[0].mxu0 }
 0x103   :  { %v113_v6 = vadd.f32 %v148_v4, %v112_v5  ;;  %v166_v7 = vpop.f32.mrb[1].mxu0 }
 0x104   :  { %v115_v8 = vpop.f32.mrb[2].mxu0 }
 0x105   :  { %v155_v9 = vpack.c.bf16 %v113_v6, %v113_v6  ;;  %v116_v10 = vadd.f32 %v148_v4, %v115_v8  ;;  %v167_v11 = vpop.f32.mrb[3].mxu0 }
 0x107   :  { %v156_v12 = vpack.c.bf16 %v116_v10, %v116_v10  ;;  %128 = vst.msk [vmem:[#allocation7] sm:$0xf] %vm127_vm2, %v155_v9 }
 0x109   :  { %129 = vst.msk [vmem:[#allocation7 + $0x4] sm:$0xf] %vm127_vm2, %v156_v12 }
 0x10a   :  { %233 = shalt.err (!%p230_p6)
}
 0x10b   :  { %s234_s15 = scalar_lea.hbm %s328_s3, 128 }
 0x10c   :  { %p235_p7 = scmp.ne.s32.totalorder %s328_s3, %s234_s15  ;;  %p238_p8 = scmp.lt.u32.totalorder %s234_s15, %s328_s3 }
 0x10e   :  { %p240_p9 = pnand %p238_p8, %p235_p7 }
 0x110   :  { %243 = shalt.err (!%p240_p9)
}
 0x111   :  { %141 = dma.vmem_to_hbm [thread:$0]  %s136_s12, 128, %s328_s3, [#allocation4], %s251_s22, %s251_s22, %s252_s23  }
 0x112   :  { %248 = dma.done.wait [#allocation4], 128  }
 0x113   :  { %249 = vsyncadd [#allocation4], 4294967168 }
 0x114   :  { %145 = vsyncpa [#allocation3], 1 }
 0x115   :  { %146 = vsyncpa [#allocation6], 1 }
 0x116   :  { %147 = vsyncpa [#allocation4], 1 }

</bundles_post_ra>
